<compile_context>
chip_gen: v5e
topology: v5e:2x2
jax: 0.10.0
libtpu: 0.0.40
codegen_flags: <defaults>
</compile_context>

<pallas_src>
import functools

import jax
import jax.numpy as jnp
from jax.experimental import pallas as pl
from jax.experimental.pallas import tpu as pltpu  # noqa: F401  (TPU backend)


# Padded tile geometry (vreg-aligned): sublane 8, lane 128.
M_PAD = 8     # batch rows, padded to one sublane group
K_PAD = 8     # contraction dim (real K = 4), padded to sublane multiple
N_PAD = 128   # fused output columns (real: 4 + 1 + 2 = 7), lane-dense


def _dictdense_kernel(x_ref, w_ref, o_ref):
    # x_ref: (M_PAD, K_PAD) f32, real data in [:M, :4], zero elsewhere.
    # w_ref: (K_PAD, N_PAD) f32, real data in [:4, :7], zero elsewhere.
    # One MXU pass on fully aligned tiles; zero padding contributes nothing.
    o_ref[...] = jnp.dot(
        x_ref[...], w_ref[...], preferred_element_type=jnp.float32
    ).astype(o_ref.dtype)


# Single-block call: no grid, no scalar prefetch, whole arrays in VMEM.
_FUSED_MM = pl.pallas_call(
    _dictdense_kernel,
    out_shape=jax.ShapeDtypeStruct((M_PAD, N_PAD), jnp.float32),
    in_specs=[
        pl.BlockSpec((M_PAD, K_PAD), lambda: (0, 0)),
        pl.BlockSpec((K_PAD, N_PAD), lambda: (0, 0)),
    ],
    out_specs=pl.BlockSpec((M_PAD, N_PAD), lambda: (0, 0)),
)


@functools.partial(jax.jit, static_argnames=("col_start", "n_out"))
def dict_dense_forward(x: jax.Array, w_packed: jax.Array,
                       *, col_start: int, n_out: int) -> jax.Array:
    """x: (M<=8, K<=8) f32; w_packed: (K_PAD, N_PAD) f32 -> (M, n_out)."""
    M, K = x.shape
    assert M <= M_PAD and K <= K_PAD, "demo wrapper sized for M<=8, K<=8"
    # Exact-zero padding so the padded contraction terms vanish.
    x_pad = jnp.zeros((M_PAD, K_PAD), jnp.float32).at[:M, :K].set(x)
    out_pad = _FUSED_MM(x_pad, w_packed)
    # Static column slice selects the requested head; fuses under jit.
    return out_pad[:M, col_start:col_start + n_out]


class MyDictDense:
    """JAX/Pallas port of the PyTorch MyDictDense module."""

    _NAMES = ("linear1", "linear2", "linear3")

    def __init__(self, key):
        k1, k2, k3 = jax.random.split(key, 3)
        # Deterministic stand-ins for torch.randn parameters.
        self.params = {
            "linear1": jax.random.normal(k1, (4, 4), dtype=jnp.float32),
            "linear2": jax.random.normal(k2, (4, 1), dtype=jnp.float32),
            "linear3": jax.random.normal(k3, (4, 2), dtype=jnp.float32),
        }
        # Pack all heads column-wise into one lane-dense (8, 128) tile.
        w_packed = jnp.zeros((K_PAD, N_PAD), jnp.float32)
        self._cols = {}
        col = 0
        for name in self._NAMES:
            w = self.params[name]
            k, n = w.shape
            w_packed = w_packed.at[:k, col:col + n].set(w)
            self._cols[name] = (col, n)
            col += n
        self.w_packed = w_packed

    def __call__(self, x, choice="linear1"):
        col_start, n_out = self._cols[choice]
        return dict_dense_forward(
            x, self.w_packed, col_start=col_start, n_out=n_out
        )


if __name__ == "__main__":
    key = jax.random.PRNGKey(0)
    net = MyDictDense(key)

    # Same input as the reference script: x = torch.ones(1, 4)
    x = jnp.ones((1, 4), dtype=jnp.float32)

    for choice in ("linear1", "linear2", "linear3"):
        y = net(x, choice=choice)
        jax.block_until_ready(y)
        # Cross-check against plain-JAX reference (torch.mm semantics).
        ref = x @ net.params[choice]
        assert y.shape == ref.shape, (y.shape, ref.shape)
        assert jnp.allclose(y, ref, atol=1e-5, rtol=1e-5), (y, ref)

    print("KERNEL_OK")
</pallas_src>

<mosaic_0001>
module attributes {stable_mosaic.version = 11 : i64} {
  func.func @_dictdense_kernel(%arg0: memref<8x8xf32, #tpu.memory_space<vmem>>, %arg1: memref<8x128xf32, #tpu.memory_space<vmem>>, %arg2: memref<8x128xf32, #tpu.memory_space<vmem>>) attributes {dimension_semantics = [], scalar_prefetch = 0 : i64, scratch_operands = 0 : i64, tpu.core_type = #tpu.core_type<tc>} {
    %c0 = arith.constant 0 : index
    %c0_0 = arith.constant 0 : index
    %0 = vector.load %arg0[%c0, %c0_0] : memref<8x8xf32, #tpu.memory_space<vmem>>, vector<8x8xf32>
    %c0_1 = arith.constant 0 : index
    %c0_2 = arith.constant 0 : index
    %1 = vector.load %arg1[%c0_1, %c0_2] : memref<8x128xf32, #tpu.memory_space<vmem>>, vector<8x128xf32>
    %cst = arith.constant dense<0.000000e+00> : vector<8x128xf32>
    %2 = tpu.matmul %0, %1, %cst {dimension_numbers = #tpu.dot_dimension_numbers<[1], [0], [0], [1], [0, 0, 1, 1], [], []>} : vector<8x8xf32>, vector<8x128xf32>, vector<8x128xf32> -> vector<8x128xf32>
    %c0_3 = arith.constant 0 : index
    %c0_4 = arith.constant 0 : index
    %3 = vector.load %arg2[%c0_3, %c0_4] : memref<8x128xf32, #tpu.memory_space<vmem>>, vector<8x128xf32>
    tpu.vector_store %arg2[%c0_3, %c0_4], %2 {strides = array<i32>} : memref<8x128xf32, #tpu.memory_space<vmem>>, vector<8x128xf32>,
    return
  }
}

</mosaic_0001>

<bundles_post_ra>
// kernel: dict_dense_forward.1
= control target key start
LH: loop header
LB: loop body
LE: loop exit
PB: predicated region body
PF: predicated region fallthrough
CT: control target
= control target key end

     0   :  { %vm13_vm0 = vcmask 64512   ;;  %s67_s1 = inlined_call_operand.vmem [shape: f32[8,128], index: 1, kind: input, shape index: {}]   ;;  %s68_s0 = inlined_call_operand.vmem [shape: f32[8,8], index: 0, kind: input, shape index: {}]   ;;  %s69_s2 = inlined_call_operand.vmem [shape: f32[8,128], index: 2, kind: output, shape index: {}]  }
   0x1   :  { %v12_v0 = vld [vmem:[%s67_s1] sm:$0xff] }
   0x2   :  { %v11_v1 = vld [vmem:[%s68_s0] sm:$0xff]  ;;  %32 = vmatpush.msra.mxu0 %v12_v0 }
   0x3   :  { %42 = vmatmul.msk.f32.vlgmr.msra.gmra.mxu0 %vm13_vm0, %v11_v1 }
  0x80   :  { %v34_v2 = vpop.f32.mrf.mxu0 }
  0x81   :  { %37 = vst [vmem:[%s69_s2] sm:$0xff] %v34_v2 }

</bundles_post_ra>
